<compile_context>
chip_gen: v6e
topology: v6e:2x2x1
jax: 0.10.0
libtpu: 0.0.40
codegen_flags: <defaults>
</compile_context>

<pallas_src>
import math
import functools

import jax
import jax.numpy as jnp
from jax.experimental import pallas as pl
from jax.experimental.pallas import tpu as pltpu

_INV_SQRT2 = 1.0 / math.sqrt(2.0)


def _gelu_exact(h):
    # Exact erf-based GELU (matches torch.nn.GELU() default), f32 math.
    return 0.5 * h * (1.0 + jax.lax.erf(h * _INV_SQRT2))


def _ff_kernel_resident(x_ref, w1_ref, b1_ref, w2_ref, b2_ref, o_ref):
    # Single hidden chunk: W1/W2/b1/b2 have constant index_maps -> fetched once and
    # kept VMEM-resident across all row tiles.  No accumulator scratch needed.
    h = jnp.dot(x_ref[...], w1_ref[...], preferred_element_type=jnp.float32)
    h = _gelu_exact(h + b1_ref[...].astype(jnp.float32))
    out = jnp.dot(h.astype(w2_ref.dtype), w2_ref[...],
                  preferred_element_type=jnp.float32)
    o_ref[...] = (out + b2_ref[...].astype(jnp.float32)).astype(o_ref.dtype)


def _ff_kernel_chunked(x_ref, w1_ref, b1_ref, w2_ref, b2_ref, o_ref, acc_ref):
    # grid = (row_tiles, hidden_chunks); hidden (reduction of the 2nd matmul) is last.
    j = pl.program_id(1)

    @pl.when(j == 0)
    def _():
        acc_ref[...] = jnp.zeros_like(acc_ref)

    h = jnp.dot(x_ref[...], w1_ref[...], preferred_element_type=jnp.float32)
    h = _gelu_exact(h + b1_ref[...].astype(jnp.float32))
    acc_ref[...] += jnp.dot(h.astype(w2_ref.dtype), w2_ref[...],
                            preferred_element_type=jnp.float32)

    @pl.when(j == pl.num_programs(1) - 1)
    def _():
        o_ref[...] = (acc_ref[...] + b2_ref[...].astype(jnp.float32)).astype(o_ref.dtype)


def _round_up(x, m):
    return (x + m - 1) // m * m


def _cdiv(a, b):
    return (a + b - 1) // b


def _vmem_limit_bytes():
    # Per-generation VMEM limit with headroom below physical capacity:
    # v7x (64 MiB physical) -> ~48 MiB; v5e/v6e (128 MiB) -> ~100 MiB.
    try:
        cap = int(pltpu.get_tpu_info().vmem_capacity_bytes)
    except Exception:
        cap = 64 * 1024 * 1024
    return max(32 * 1024 * 1024, min(cap - 16 * 1024 * 1024, 100 * 1024 * 1024))


def _vmem_needed(tm, th, dim, x_item, w_item, out_item, chunked):
    # Conservative estimate: double-buffered x/out tiles and weight/bias slices,
    # the f32 intermediate h tile, and the f32 accumulator when chunked.
    x_tile = 2 * tm * dim * x_item
    o_tile = 2 * tm * dim * out_item
    w_slices = 2 * (dim * th + th * dim) * w_item
    biases = 2 * (th + dim) * 4
    h_tmp = tm * th * 4
    acc = tm * dim * 4 if chunked else 0
    return x_tile + o_tile + w_slices + biases + h_tmp + acc


def _largest_aligned_divisor(hidden, upper, align=128):
    best = None
    d = align
    while d <= min(upper, hidden):
        if hidden % d == 0:
            best = d
        d += align
    return best


@functools.partial(jax.jit, static_argnames=("tm", "th"))
def feed_forward(x, w1, b1, w2, b2, *, tm=512, th=2048):
    """x: [B, N, dim]; w1: [dim, hidden]; b1: [hidden]; w2: [hidden, dim]; b2: [dim]."""
    B, N, dim = x.shape
    hidden = w1.shape[1]
    M = B * N

    x_item = jnp.dtype(x.dtype).itemsize
    w_item = jnp.dtype(w1.dtype).itemsize

    # Row tile: large (feeds the MXU), clamped to the token count for tiny inputs,
    # aligned to the sublane minimum (8 for f32, 16 for bf16).
    sub = 16 if x.dtype == jnp.bfloat16 else 8
    tm_eff = _round_up(min(tm, _round_up(M, sub)), sub)
    # Keep >=2 row tiles (v7x has 2 TensorCores sharded along the 'parallel' axis)
    # when there is enough work to split.
    if M >= 1024 and _cdiv(M, tm_eff) < 2:
        tm_eff = _round_up(_cdiv(M, 2), sub)

    vmem_limit = _vmem_limit_bytes()
    budget = int(vmem_limit * 0.85)

    # Prefer VMEM-resident weights (single hidden chunk): weights are DMA'd once.
    if _vmem_needed(tm_eff, hidden, dim, x_item, w_item, x_item, chunked=False) <= budget:
        chunked = False
        th_eff = hidden
    else:
        chunked = True
        th_eff = _largest_aligned_divisor(hidden, min(th, hidden)) or hidden
        # Shrink the hidden chunk until the working set fits the budget.
        while th_eff > 128:
            if _vmem_needed(tm_eff, th_eff, dim, x_item, w_item, x_item, True) <= budget:
                break
            smaller = _largest_aligned_divisor(hidden, th_eff - 1)
            if smaller is None or smaller >= th_eff:
                break
            th_eff = smaller
        # TODO(synk): if hidden has no 128-aligned divisor, consider padding hidden
        # instead of keeping the full hidden slice resident.

    x2 = x.reshape(M, dim)          # no host-side padding; Pallas masks the ragged tail
    b1_2 = b1.reshape(1, hidden)
    b2_2 = b2.reshape(1, dim)

    grid_m = _cdiv(M, tm_eff)

    weight_bytes = (w1.size * w_item + w2.size * jnp.dtype(w2.dtype).itemsize)
    bytes_accessed = (x2.size * x_item                      # x read
                      + M * dim * x_item                    # output write
                      + b1.size * jnp.dtype(b1.dtype).itemsize
                      + b2.size * jnp.dtype(b2.dtype).itemsize
                      + weight_bytes * (1 if not chunked else grid_m))
    cost = pl.CostEstimate(
        flops=4 * M * dim * hidden,        # two matmuls
        transcendentals=M * hidden,        # erf per hidden element
        bytes_accessed=bytes_accessed,
    )

    if not chunked:
        out = pl.pallas_call(
            _ff_kernel_resident,
            out_shape=jax.ShapeDtypeStruct((M, dim), x.dtype),
            grid_spec=pltpu.PrefetchScalarGridSpec(
                num_scalar_prefetch=0,
                grid=(grid_m,),
                in_specs=[
                    pl.BlockSpec((tm_eff, dim), lambda i: (i, 0)),   # x row tile
                    pl.BlockSpec((dim, hidden), lambda i: (0, 0)),   # W1 (resident)
                    pl.BlockSpec((1, hidden), lambda i: (0, 0)),     # b1 (resident)
                    pl.BlockSpec((hidden, dim), lambda i: (0, 0)),   # W2 (resident)
                    pl.BlockSpec((1, dim), lambda i: (0, 0)),        # b2 (resident)
                ],
                out_specs=pl.BlockSpec((tm_eff, dim), lambda i: (i, 0)),
            ),
            compiler_params=pltpu.CompilerParams(
                dimension_semantics=("parallel",),
                vmem_limit_bytes=vmem_limit,
            ),
            cost_estimate=cost,
        )(x2, w1, b1_2, w2, b2_2)
    else:
        grid = (grid_m, hidden // th_eff)
        out = pl.pallas_call(
            _ff_kernel_chunked,
            out_shape=jax.ShapeDtypeStruct((M, dim), x.dtype),
            grid_spec=pltpu.PrefetchScalarGridSpec(
                num_scalar_prefetch=0,
                grid=grid,
                in_specs=[
                    pl.BlockSpec((tm_eff, dim), lambda i, j: (i, 0)),   # x row tile
                    pl.BlockSpec((dim, th_eff), lambda i, j: (0, j)),   # W1 hidden chunk
                    pl.BlockSpec((1, th_eff), lambda i, j: (0, j)),     # b1 hidden chunk
                    pl.BlockSpec((th_eff, dim), lambda i, j: (j, 0)),   # W2 hidden chunk
                    pl.BlockSpec((1, dim), lambda i, j: (0, 0)),        # b2 (full)
                ],
                out_specs=pl.BlockSpec((tm_eff, dim), lambda i, j: (i, 0)),
                scratch_shapes=[pltpu.VMEM((tm_eff, dim), jnp.float32)],
            ),
            compiler_params=pltpu.CompilerParams(
                dimension_semantics=("parallel", "arbitrary"),
                vmem_limit_bytes=vmem_limit,
            ),
            cost_estimate=cost,
        )(x2, w1, b1_2, w2, b2_2)

    return out.reshape(B, N, dim)


def _reference(x, w1, b1, w2, b2):
    h = x @ w1 + b1
    h = 0.5 * h * (1.0 + jax.lax.erf(h / math.sqrt(2.0)))
    return h @ w2 + b2


if __name__ == "__main__":
    # Small, forward-consistent shapes: batch=2, seq=8 tokens, dim=32, hidden=64.
    B, N, dim, hidden = 2, 8, 32, 64

    key = jax.random.PRNGKey(0)
    kx, kw1, kb1, kw2, kb2 = jax.random.split(key, 5)

    x = jax.random.normal(kx, (B, N, dim), dtype=jnp.float32)

    # nn.Linear weights are (out, in); the kernel consumes (in, out).
    w1_t = jax.random.normal(kw1, (hidden, dim), dtype=jnp.float32) * (1.0 / math.sqrt(dim))
    b1 = jax.random.normal(kb1, (hidden,), dtype=jnp.float32) * 0.01
    w2_t = jax.random.normal(kw2, (dim, hidden), dtype=jnp.float32) * (1.0 / math.sqrt(hidden))
    b2 = jax.random.normal(kb2, (dim,), dtype=jnp.float32) * 0.01

    w1 = w1_t.T  # (dim, hidden)
    w2 = w2_t.T  # (hidden, dim)

    out = feed_forward(x, w1, b1, w2, b2)
    jax.block_until_ready(out)

    ref = _reference(x, w1, b1, w2, b2)
    assert out.shape == (B, N, dim)
    assert jnp.allclose(out, ref, atol=1e-5, rtol=1e-5), "mismatch vs reference"

    print("KERNEL_OK")
</pallas_src>

<mosaic_0001>
module attributes {stable_mosaic.version = 11 : i64} {
  func.func @_ff_kernel_resident(%arg0: i32, %arg1: memref<16x32xf32, #tpu.memory_space<vmem>>, %arg2: memref<32x64xf32, #tpu.memory_space<vmem>>, %arg3: memref<1x64xf32, #tpu.memory_space<vmem>>, %arg4: memref<64x32xf32, #tpu.memory_space<vmem>>, %arg5: memref<1x32xf32, #tpu.memory_space<vmem>>, %arg6: memref<16x32xf32, #tpu.memory_space<vmem>>) attributes {dimension_semantics = [#tpu.dimension_semantics<parallel>], iteration_bounds = array<i64: 1>, scalar_prefetch = 0 : i64, scratch_operands = 0 : i64, tpu.core_type = #tpu.core_type<tc>, window_params = [{transform_indices = @transform_0, window_bounds = array<i64: 16, 32>}, {pipeline_mode = #tpu.pipeline_mode<synchronous>, transform_indices = @transform_1, window_bounds = array<i64: 32, 64>}, {pipeline_mode = #tpu.pipeline_mode<synchronous>, transform_indices = @transform_2, window_bounds = array<i64: 1, 64>}, {pipeline_mode = #tpu.pipeline_mode<synchronous>, transform_indices = @transform_3, window_bounds = array<i64: 64, 32>}, {pipeline_mode = #tpu.pipeline_mode<synchronous>, transform_indices = @transform_4, window_bounds = array<i64: 1, 32>}, {transform_indices = @transform_5, window_bounds = array<i64: 16, 32>}]} {
    %c0 = arith.constant 0 : index
    %c0_0 = arith.constant 0 : index
    %0 = vector.load %arg1[%c0, %c0_0] : memref<16x32xf32, #tpu.memory_space<vmem>>, vector<16x32xf32>
    %c0_1 = arith.constant 0 : index
    %c0_2 = arith.constant 0 : index
    %1 = vector.load %arg2[%c0_1, %c0_2] : memref<32x64xf32, #tpu.memory_space<vmem>>, vector<32x64xf32>
    %cst = arith.constant dense<0.000000e+00> : vector<16x64xf32>
    %2 = tpu.matmul %0, %1, %cst {dimension_numbers = #tpu.dot_dimension_numbers<[1], [0], [0], [1], [0, 0, 1, 1], [], []>} : vector<16x32xf32>, vector<32x64xf32>, vector<16x64xf32> -> vector<16x64xf32>
    %c0_3 = arith.constant 0 : index
    %c0_4 = arith.constant 0 : index
    %3 = vector.load %arg3[%c0_3, %c0_4] : memref<1x64xf32, #tpu.memory_space<vmem>>, vector<1x64xf32>
    %4 = vector.broadcast %3 : vector<1x64xf32> to vector<16x64xf32>
    %5 = arith.addf %2, %4 : vector<16x64xf32>
    %cst_5 = arith.constant 5.000000e-01 : f32
    %6 = vector.broadcast %cst_5 : f32 to vector<16x64xf32>
    %7 = arith.mulf %6, %5 : vector<16x64xf32>
    %cst_6 = arith.constant 0.707106769 : f32
    %8 = vector.broadcast %cst_6 : f32 to vector<16x64xf32>
    %9 = arith.mulf %5, %8 : vector<16x64xf32>
    %10 = math.erf %9 : vector<16x64xf32>
    %cst_7 = arith.constant 1.000000e+00 : f32
    %11 = vector.broadcast %cst_7 : f32 to vector<16x64xf32>
    %12 = arith.addf %11, %10 : vector<16x64xf32>
    %13 = arith.mulf %7, %12 : vector<16x64xf32>
    %c0_8 = arith.constant 0 : index
    %c0_9 = arith.constant 0 : index
    %14 = vector.load %arg4[%c0_8, %c0_9] : memref<64x32xf32, #tpu.memory_space<vmem>>, vector<64x32xf32>
    %cst_10 = arith.constant dense<0.000000e+00> : vector<16x32xf32>
    %15 = tpu.matmul %13, %14, %cst_10 {dimension_numbers = #tpu.dot_dimension_numbers<[1], [0], [0], [1], [0, 0, 1, 1], [], []>} : vector<16x64xf32>, vector<64x32xf32>, vector<16x32xf32> -> vector<16x32xf32>
    %c0_11 = arith.constant 0 : index
    %c0_12 = arith.constant 0 : index
    %16 = vector.load %arg5[%c0_11, %c0_12] : memref<1x32xf32, #tpu.memory_space<vmem>>, vector<1x32xf32>
    %17 = vector.broadcast %16 : vector<1x32xf32> to vector<16x32xf32>
    %18 = arith.addf %15, %17 : vector<16x32xf32>
    %c0_13 = arith.constant 0 : index
    %c0_14 = arith.constant 0 : index
    %19 = vector.load %arg6[%c0_13, %c0_14] : memref<16x32xf32, #tpu.memory_space<vmem>>, vector<16x32xf32>
    tpu.vector_store %arg6[%c0_13, %c0_14], %18 {strides = array<i32>} : memref<16x32xf32, #tpu.memory_space<vmem>>, vector<16x32xf32>,
    return
  }
  func.func @transform_0(%arg0: i32) -> (i32, i32) {
    %c0_i32 = arith.constant 0 : i32
    %c0_i32_0 = arith.constant 0 : i32
    return %arg0, %c0_i32 : i32, i32
  }
  func.func @transform_1(%arg0: i32) -> (i32, i32) {
    %c0_i32 = arith.constant 0 : i32
    %c0_i32_0 = arith.constant 0 : i32
    %c0_i32_1 = arith.constant 0 : i32
    return %c0_i32, %c0_i32_0 : i32, i32
  }
  func.func @transform_2(%arg0: i32) -> (i32, i32) {
    %c0_i32 = arith.constant 0 : i32
    %c0_i32_0 = arith.constant 0 : i32
    %c0_i32_1 = arith.constant 0 : i32
    return %c0_i32, %c0_i32_0 : i32, i32
  }
  func.func @transform_3(%arg0: i32) -> (i32, i32) {
    %c0_i32 = arith.constant 0 : i32
    %c0_i32_0 = arith.constant 0 : i32
    %c0_i32_1 = arith.constant 0 : i32
    return %c0_i32, %c0_i32_0 : i32, i32
  }
  func.func @transform_4(%arg0: i32) -> (i32, i32) {
    %c0_i32 = arith.constant 0 : i32
    %c0_i32_0 = arith.constant 0 : i32
    %c0_i32_1 = arith.constant 0 : i32
    return %c0_i32, %c0_i32_0 : i32, i32
  }
  func.func @transform_5(%arg0: i32) -> (i32, i32) {
    %c0_i32 = arith.constant 0 : i32
    %c0_i32_0 = arith.constant 0 : i32
    return %arg0, %c0_i32 : i32, i32
  }
}

</mosaic_0001>

<bundles_post_ra>
// kernel: feed_forward.1
= control target key start
LH: loop header
LB: loop body
LE: loop exit
PB: predicated region body
PF: predicated region fallthrough
CT: control target
= control target key end

     0   :  { %vm34_vm0 = vcmask 261120   ;;  %s410_s0 = inlined_call_operand.vmem [shape: f32[16,32], index: 0, kind: input, shape index: {}]   ;;  %s411_s1 = inlined_call_operand.vmem [shape: f32[32,64], index: 1, kind: input, shape index: {}]   ;;  %s412_s2 = inlined_call_operand.vmem [shape: f32[1,64], index: 2, kind: input, shape index: {}]   ;;  %s413_s3 = inlined_call_operand.vmem [shape: f32[64,32], index: 3, kind: input, shape index: {}]   ;;  %s414_s4 = inlined_call_operand.vmem [shape: f32[1,32], index: 4, kind: input, shape index: {}]   ;;  %s415_s5 = inlined_call_operand.hbm [shape: f32[16,32], index: 5, kind: output, shape index: {}]  }
   0x1   :  { %v26_v0 = vld [vmem:[%s411_s1 + $0x18] sm:$0xff]  ;;  %v25_v1 = vld [vmem:[%s411_s1 + $0x10] sm:$0xff]  ;;  %v21_v2 = vld [vmem:[%s410_s0] sm:$0xff] }
   0x2   :  { %263 = vmatprep.subr.mxu0 %v26_v0  ;;  %v24_v3 = vld [vmem:[%s411_s1 + $0x8] sm:$0xff]  ;;  %271 = vmatprep.mubr.msk.f32.mxu0 %vm34_vm0, %v21_v2 }
   0x3   :  { %264 = vmatpush3.msra.mxu0 %v26_v0 }
   0x4   :  { %10 = vsyncpa [#allocation3], 0  ;;  %265 = vmatprep.subr.mxu0 %v25_v1  ;;  %v23_v4 = vld [vmem:[%s411_s1] sm:$0xff]  ;;  %v22_v5 = vld [vmem:[%s410_s0 + $0x8] sm:$0xff]  ;;  %vm141_vm1 = vcmask 523264   ;;  %s322_s21 = smov [#allocation2]  }
   0x5   :  { %266 = vmatpush3.msra.mxu0 %v25_v1  ;;  %v133_v6 = vld [vmem:[%s413_s3 + $0x38] sm:$0xff]  ;;  %v132_v7 = vld [vmem:[%s413_s3 + $0x30] sm:$0xff]  ;;  %v131_v8 = vld [vmem:[%s413_s3 + $0x28] sm:$0xff]  ;;  %s230_s22 = sshll.u32 %s322_s21, 4  ;;  %s231_s22 = int_to_ptr.vmem [resolvable:$true] %s230_s22 }
   0x6   :  { %267 = vmatprep.subr.mxu0 %v24_v3  ;;  %274 = vmatprep.subr.mxu1 %v133_v6  ;;  %v130_v9 = vld [vmem:[%s413_s3 + $0x20] sm:$0xff]  ;;  %v129_v10 = vld [vmem:[%s413_s3 + $0x18] sm:$0xff]  ;;  %v128_v11 = vld [vmem:[%s413_s3 + $0x10] sm:$0xff]  ;;  %s300_s23 = scalar_lea.vmem %s231_s22, 256  ;;  %p305_p1 = scmp.lt.s32.totalorder %s231_s22, %s231_s22 }
   0x7   :  { %268 = vmatpush3.msra.mxu0 %v24_v3  ;;  %275 = vmatpush3.msra.mxu1 %v133_v6  ;;  %v127_v12 = vld [vmem:[%s413_s3 + $0x8] sm:$0xff]  ;;  %v126_v13 = vld [vmem:[%s413_s3] sm:$0xff]  ;;  %p301_p0 = scmp.ne.s32.totalorder %s231_s22, %s300_s23  ;;  %p306_p2 = scmp.lt.s32.totalorder %s300_s23, %s300_s23 }
   0x8   :  { %269 = vmatprep.subr.mxu0 %v23_v4  ;;  %276 = vmatprep.subr.mxu1 %v132_v7  ;;  %v241_v14 = vld [vmem:[%s412_s2] ss:$0 sm:$0xff] }
   0x9   :  { %270 = vmatpush3.msra.mxu0 %v23_v4  ;;  %277 = vmatpush3.msra.mxu1 %v132_v7  ;;  %v244_v29 = vld [vmem:[%s414_s4] ss:$0 sm:$0xff]  ;;  %p307_p3 = por %p306_p2, %p305_p1 }
   0xa   :  { %272 = vmatmul.mubr.msk.f32.vlgmr.msra.gmra.mxu0 %vm34_vm0, %v22_v5  ;;  %278 = vmatprep.subr.mxu1 %v131_v8 }
   0xb   :  { %279 = vmatpush3.msra.mxu1 %v131_v8  ;;  %p308_p4 = pnand %p307_p3, %p301_p0 }
   0xc   :  { %280 = vmatprep.subr.mxu1 %v130_v9 }
   0xd   :  { %281 = vmatpush3.msra.mxu1 %v130_v9 }
   0xe   :  { %282 = vmatprep.subr.mxu1 %v129_v10 }
   0xf   :  { %283 = vmatpush3.msra.mxu1 %v129_v10 }
  0x10   :  { %284 = vmatprep.subr.mxu1 %v128_v11 }
  0x11   :  { %285 = vmatpush3.msra.mxu1 %v128_v11 }
  0x12   :  { %286 = vmatprep.subr.mxu1 %v127_v12 }
  0x13   :  { %287 = vmatpush3.msra.mxu1 %v127_v12 }
  0x14   :  { %288 = vmatprep.subr.mxu1 %v126_v13 }
  0x15   :  { %289 = vmatpush3.msra.mxu1 %v126_v13 }
  0xca   :  { %v273_v15 = vpop.f32.mrf.mxu0 }
  0xcb   :  { %v113_v16 = vadd.f32 %v273_v15, %v241_v14 }
  0xcc   :  { %v107_v17 = vpop.f32.mrf.mxu0 }
  0xcd   :  { %v119_v18 = vmul.f32 0.70710677, %v113_v16  ;;  %v108_v19 = vadd.f32 %v241_v14, %v107_v17  ;;  %v117_v26 = vmul.f32 0.5, %v113_v16 }
  0xcf   :  { %296 = verf.f32 %v119_v18  ;;  %v118_v20 = vmul.f32 0.70710677, %v108_v19  ;;  %v116_v24 = vmul.f32 0.5, %v108_v19 }
  0xd1   :  { %298 = verf.f32 %v118_v20 }
  0xdc   :  { %v297_v21 = vpop.eup %296 }
  0xdd   :  { %v123_v23 = vadd.f32 1.0, %v297_v21 }
  0xde   :  { %v299_v22 = vpop.eup %298 }
  0xdf   :  { %v122_v25 = vadd.f32 1.0, %v299_v22  ;;  %v125_v28 = vmul.f32 %v123_v23, %v117_v26 }
  0xe1   :  { %v124_v27 = vmul.f32 %v122_v25, %v116_v24 }
  0xe3   :  { %290 = vmatprep.mubr.msk.f32.mxu1 %vm141_vm1, %v124_v27 }
  0xe4   :  { %291 = vmatmul.mubr.msk.f32.vlgmr.msra.gmra.mxu1 %vm141_vm1, %v125_v28 }
 0x1a4   :  { %v292_v30 = vpop.f32.mrf.mxu1 }
 0x1a5   :  { %v220_v31 = vadd.f32 %v292_v30, %v244_v29 }
 0x1a6   :  { %v214_v32 = vpop.f32.mrf.mxu1 }
 0x1a7   :  { %224 = vst.msk [vmem:[#allocation2 + $0x8] sm:$0xff] %vm34_vm0, %v220_v31  ;;  %v215_v33 = vadd.f32 %v244_v29, %v214_v32 }
 0x1a9   :  { %223 = vst.msk [vmem:[#allocation2] sm:$0xff] %vm34_vm0, %v215_v33 }
 0x1aa   :  { %311 = shalt.err (!%p308_p4)
}
 0x1ab   :  { %s323_s24 = smov 128   ;;  %s324_s4 = smov 8  }
 0x1ac   :  { %236 = dma.vmem_to_hbm [thread:$0]  %s231_s22, 256, %s415_s5, [#allocation3], %s323_s24, %s323_s24, %s324_s4  }
 0x1ad   :  { %320 = dma.done.wait [#allocation3], 256  }
 0x1ae   :  { %321 = vsyncadd [#allocation3], 4294967040 }
 0x1af   :  { %240 = vsyncpa [#allocation3], 1 }

</bundles_post_ra>
